<compile_context>
chip_gen: v6e
topology: v6e:2x2x1
jax: 0.10.0
libtpu: 0.0.40
codegen_flags: <defaults>
</compile_context>

<pallas_src>
import math
import functools

import jax
import jax.numpy as jnp
from jax import lax
from jax.experimental import pallas as pl
from jax.experimental.pallas import tpu as pltpu


# ----------------------------------------------------------------------------
# Fused multi-head attention kernel: one batch element per grid step.
# ----------------------------------------------------------------------------
def _mha_kernel(x_ref, mask_ref, wqkv_ref, wpT_ref, bp_ref, o_ref,
                *, num_heads, head_size):
    T, C = x_ref.shape
    x = x_ref[...]                                   # (T, C)

    # Fused, lane-dense QKV projection for all heads in one MXU matmul.
    # 1/sqrt(head_size) is already folded into the Q columns by the wrapper.
    qkv = jnp.dot(x, wqkv_ref[...], preferred_element_type=jnp.float32)  # (T, 3C)

    mask_col = mask_ref[...]                         # (T, 1) per-query-row mask
    row = lax.broadcasted_iota(jnp.int32, (T, T), 0)
    col = lax.broadcasted_iota(jnp.int32, (T, T), 1)
    causal = col > row                               # True where tril == 0
    neg_inf = jnp.float32(-jnp.inf)

    head_outs = []
    for h in range(num_heads):                       # static loop, H is small
        lo = h * head_size
        hi = lo + head_size
        q = qkv[:, lo:hi]                            # (T, hs)  (pre-scaled)
        k = qkv[:, C + lo:C + hi]                    # (T, hs)
        v = qkv[:, 2 * C + lo:2 * C + hi]            # (T, hs)

        s = jnp.dot(q, k.T, preferred_element_type=jnp.float32)   # (T, T)

        # Faithful to the PyTorch module:
        #   qK = attention_mask.unsqueeze(2) * qK
        #   qK = qK.masked_fill(qK == 0, -inf)
        #   qK = qK.masked_fill(tril[:T,:T] == 0, -inf)
        s = mask_col * s
        s = jnp.where(causal | (s == 0.0), neg_inf, s)

        # Softmax; fully-masked rows -> 0 (same result as torch's
        # softmax -> isnan -> 0 path, computed without generating NaNs).
        m = jnp.max(s, axis=-1, keepdims=True)       # -inf on fully-masked rows
        row_valid = m > neg_inf
        p = jnp.exp(s - jnp.where(row_valid, m, 0.0))
        denom = jnp.sum(p, axis=-1, keepdims=True)
        inv = pl.reciprocal(jnp.where(row_valid, denom, 1.0))
        attn = jnp.where(row_valid, p * inv, 0.0)

        # TODO(synk): attention dropout omitted (pDropout=0.0 / eval mode).
        head_outs.append(
            jnp.dot(attn, v, preferred_element_type=jnp.float32))  # (T, hs)

    # Concatenate heads on the lane axis, then ONE projection matmul.
    heads_cat = jnp.concatenate(head_outs, axis=-1)                # (T, C)
    out = jnp.dot(heads_cat, wpT_ref[...],
                  preferred_element_type=jnp.float32) + bp_ref[...]

    # TODO(synk): output dropout omitted (pDropout=0.0 / eval mode).
    o_ref[...] = out                                 # (T, C) lane-dense store


# ----------------------------------------------------------------------------
# Wrapper
# ----------------------------------------------------------------------------
def multi_head_attention(x, attention_mask, wq, wk, wv, wp, bp):
    B, T, C = x.shape
    H, hs, _ = wq.shape
    assert H * hs == C, "num_heads * head_size must equal n_emb"
    scale = 1.0 / math.sqrt(hs)

    # Pre-transpose / fuse weights once in the wrapper (layout plumbing, free):
    #   W_qkv : (C, 3C), columns ordered [Q heads | K heads | V heads],
    #           with 1/sqrt(hs) folded into the Q block.
    #   Wp^T  : (C, C)
    wq_f = (wq * scale).astype(jnp.float32).reshape(H * hs, C)
    wk_f = wk.astype(jnp.float32).reshape(H * hs, C)
    wv_f = wv.astype(jnp.float32).reshape(H * hs, C)
    w_qkv = jnp.concatenate([wq_f, wk_f, wv_f], axis=0).T      # (C, 3C)
    wpT = wp.astype(jnp.float32).T                              # (C, C)
    bp2 = bp.astype(jnp.float32).reshape(1, C)
    mask3 = attention_mask.astype(jnp.float32).reshape(B, T, 1)

    # Advisory cost estimate for the XLA scheduler.
    flops = B * (2 * T * C * (3 * C)                    # fused QKV projection
                 + H * (2 * T * T * hs + 2 * T * T * hs)  # scores + attn@v
                 + 2 * T * C * C)                       # output projection
    cost = pl.CostEstimate(
        flops=flops,
        transcendentals=B * H * T * T,
        bytes_accessed=4 * (2 * B * T * C + B * T + 3 * C * C + C * C + C),
    )

    kernel = functools.partial(_mha_kernel, num_heads=H, head_size=hs)

    out = pl.pallas_call(
        kernel,
        out_shape=jax.ShapeDtypeStruct((B, T, C), jnp.float32),
        grid_spec=pltpu.PrefetchScalarGridSpec(
            num_scalar_prefetch=0,
            grid=(B,),
            in_specs=[
                pl.BlockSpec((None, T, C), lambda b: (b, 0, 0)),   # x
                pl.BlockSpec((None, T, 1), lambda b: (b, 0, 0)),   # mask (rows)
                pl.BlockSpec((C, 3 * C), lambda b: (0, 0)),        # fused QKV (resident)
                pl.BlockSpec((C, C), lambda b: (0, 0)),            # Wp^T (resident)
                pl.BlockSpec((1, C), lambda b: (0, 0)),            # bias
            ],
            out_specs=pl.BlockSpec((None, T, C), lambda b: (b, 0, 0)),
        ),
        compiler_params=pltpu.CompilerParams(
            # Batch axis is independent -> shards across TensorCores on v7x.
            dimension_semantics=("parallel",),
        ),
        cost_estimate=cost,
    )(x.astype(jnp.float32), mask3, w_qkv, wpT, bp2)

    return out


# ----------------------------------------------------------------------------
# Pure-JAX reference (mirrors the PyTorch forward exactly)
# ----------------------------------------------------------------------------
def _reference(x, attention_mask, wq, wk, wv, wp, bp):
    B, T, C = x.shape
    H, hs, _ = wq.shape
    scale = 1.0 / math.sqrt(hs)
    tril = jnp.tril(jnp.ones((T, T), jnp.float32))
    outs = []
    for h in range(H):
        q = x @ wq[h].T
        k = x @ wk[h].T
        v = x @ wv[h].T
        s = (q @ jnp.swapaxes(k, -1, -2)) * scale
        s = attention_mask[:, :, None] * s
        s = jnp.where(s == 0.0, -jnp.inf, s)
        s = jnp.where(tril == 0.0, -jnp.inf, s)
        m = jnp.max(s, axis=-1, keepdims=True)
        p = jnp.exp(s - m)
        attn = p / jnp.sum(p, axis=-1, keepdims=True)
        attn = jnp.where(jnp.isnan(attn), 0.0, attn)
        outs.append(attn @ v)
    cat = jnp.concatenate(outs, axis=-1)
    return cat @ wp.T + bp


# ----------------------------------------------------------------------------
# Main
# ----------------------------------------------------------------------------
if __name__ == "__main__":
    # Module hyperparameters (small, consistent with the PyTorch module)
    B, T = 2, 8
    num_heads, head_size = 4, 8
    n_emb = num_heads * head_size          # 32
    max_length = 16                        # T <= max_length
    # pDropout = 0.0 (dropout is identity)

    key = jax.random.PRNGKey(0)
    kx, kq, kk, kv, kp, kb = jax.random.split(key, 6)

    x = jax.random.normal(kx, (B, T, n_emb), dtype=jnp.float32)

    # attention_mask: (B, T) of {0, 1}; zero out the last two query rows of batch 1
    attention_mask = jnp.ones((B, T), dtype=jnp.float32)
    attention_mask = attention_mask.at[1, 6:].set(0.0)

    # Deterministic parameter init (nn.Linear layout: (out_features, in_features))
    init_scale = 1.0 / math.sqrt(n_emb)
    wq = jax.random.normal(kq, (num_heads, head_size, n_emb), jnp.float32) * init_scale
    wk = jax.random.normal(kk, (num_heads, head_size, n_emb), jnp.float32) * init_scale
    wv = jax.random.normal(kv, (num_heads, head_size, n_emb), jnp.float32) * init_scale
    wp = jax.random.normal(kp, (n_emb, n_emb), jnp.float32) * init_scale
    bp = jax.random.normal(kb, (n_emb,), jnp.float32) * init_scale

    out = multi_head_attention(x, attention_mask, wq, wk, wv, wp, bp)
    out = jax.block_until_ready(out)

    ref = _reference(x, attention_mask, wq, wk, wv, wp, bp)
    assert out.shape == (B, T, n_emb)
    assert jnp.all(jnp.isfinite(out)), "non-finite values in kernel output"
    assert jnp.allclose(out, ref, atol=1e-4, rtol=1e-4), "mismatch vs reference"

    print("KERNEL_OK")
</pallas_src>

<mosaic_0001>
module attributes {stable_mosaic.version = 11 : i64} {
  func.func @_mha_kernel(%arg0: i32, %arg1: memref<1x8x32xf32, #tpu.memory_space<vmem>>, %arg2: memref<1x8x1xf32, #tpu.memory_space<vmem>>, %arg3: memref<32x96xf32, #tpu.memory_space<vmem>>, %arg4: memref<32x32xf32, #tpu.memory_space<vmem>>, %arg5: memref<1x32xf32, #tpu.memory_space<vmem>>, %arg6: memref<1x8x32xf32, #tpu.memory_space<vmem>>) attributes {dimension_semantics = [#tpu.dimension_semantics<parallel>], iteration_bounds = array<i64: 2>, scalar_prefetch = 0 : i64, scratch_operands = 0 : i64, tpu.core_type = #tpu.core_type<tc>, window_params = [{transform_indices = @transform_0, window_bounds = array<i64: 1, 8, 32>}, {transform_indices = @transform_1, window_bounds = array<i64: 1, 8, 1>}, {pipeline_mode = #tpu.pipeline_mode<synchronous>, transform_indices = @transform_2, window_bounds = array<i64: 32, 96>}, {pipeline_mode = #tpu.pipeline_mode<synchronous>, transform_indices = @transform_3, window_bounds = array<i64: 32, 32>}, {pipeline_mode = #tpu.pipeline_mode<synchronous>, transform_indices = @transform_4, window_bounds = array<i64: 1, 32>}, {transform_indices = @transform_5, window_bounds = array<i64: 1, 8, 32>}]} {
    %c0 = arith.constant 0 : index
    %c0_0 = arith.constant 0 : index
    %c0_1 = arith.constant 0 : index
    %0 = vector.load %arg1[%c0, %c0_0, %c0_1] : memref<1x8x32xf32, #tpu.memory_space<vmem>>, vector<1x8x32xf32>
    %1 = vector.shape_cast %0 : vector<1x8x32xf32> to vector<8x32xf32>
    %c0_2 = arith.constant 0 : index
    %c0_3 = arith.constant 0 : index
    %2 = vector.load %arg3[%c0_2, %c0_3] : memref<32x96xf32, #tpu.memory_space<vmem>>, vector<32x96xf32>
    %cst = arith.constant dense<0.000000e+00> : vector<8x96xf32>
    %3 = tpu.matmul %1, %2, %cst {dimension_numbers = #tpu.dot_dimension_numbers<[1], [0], [0], [1], [0, 0, 1, 1], [], []>} : vector<8x32xf32>, vector<32x96xf32>, vector<8x96xf32> -> vector<8x96xf32>
    %c0_4 = arith.constant 0 : index
    %c0_5 = arith.constant 0 : index
    %c0_6 = arith.constant 0 : index
    %4 = vector.load %arg2[%c0_4, %c0_5, %c0_6] : memref<1x8x1xf32, #tpu.memory_space<vmem>>, vector<1x8x1xf32>
    %5 = vector.shape_cast %4 : vector<1x8x1xf32> to vector<8x1xf32>
    %6 = tpu.iota {dimensions = array<i32: 0>} : vector<8x8xi32>
    %7 = tpu.iota {dimensions = array<i32: 1>} : vector<8x8xi32>
    %8 = arith.cmpi sgt, %7, %6 : vector<8x8xi32>
    %9 = vector.extract_strided_slice %3 {offsets = [0, 0], sizes = [8, 8], strides = [1, 1]} : vector<8x96xf32> to vector<8x8xf32>
    %10 = vector.extract_strided_slice %3 {offsets = [0, 32], sizes = [8, 8], strides = [1, 1]} : vector<8x96xf32> to vector<8x8xf32>
    %11 = vector.extract_strided_slice %3 {offsets = [0, 64], sizes = [8, 8], strides = [1, 1]} : vector<8x96xf32> to vector<8x8xf32>
    %12 = tpu.transpose %10, [1, 0] : vector<8x8xf32> -> vector<8x8xf32>
    %cst_7 = arith.constant dense<0.000000e+00> : vector<8x8xf32>
    %13 = tpu.matmul %9, %12, %cst_7 {dimension_numbers = #tpu.dot_dimension_numbers<[1], [0], [0], [1], [0, 0, 1, 1], [], []>} : vector<8x8xf32>, vector<8x8xf32>, vector<8x8xf32> -> vector<8x8xf32>
    %14 = vector.broadcast %5 : vector<8x1xf32> to vector<8x8xf32>
    %15 = arith.mulf %14, %13 : vector<8x8xf32>
    %cst_8 = arith.constant 0.000000e+00 : f32
    %16 = vector.broadcast %cst_8 : f32 to vector<8x8xf32>
    %17 = arith.cmpf oeq, %15, %16 : vector<8x8xf32>
    %18 = arith.ori %8, %17 : vector<8x8xi1>
    %cst_9 = arith.constant 0xFF800000 : f32
    %19 = vector.broadcast %cst_9 : f32 to vector<8x8xf32>
    %20 = arith.select %18, %19, %15 : vector<8x8xi1>, vector<8x8xf32>
    %cst_10 = arith.constant dense<0xFF800000> : vector<8xf32>
    %21 = vector.multi_reduction <maximumf>, %20, %cst_10 [1] : vector<8x8xf32> to vector<8xf32>
    %22 = vector.shape_cast %21 : vector<8xf32> to vector<8x1xf32>
    %cst_11 = arith.constant 0xFF800000 : f32
    %23 = vector.broadcast %cst_11 : f32 to vector<8x1xf32>
    %24 = arith.cmpf ogt, %22, %23 : vector<8x1xf32>
    %cst_12 = arith.constant 0.000000e+00 : f32
    %25 = vector.broadcast %cst_12 : f32 to vector<8x1xf32>
    %26 = arith.select %24, %22, %25 : vector<8x1xi1>, vector<8x1xf32>
    %27 = vector.broadcast %26 : vector<8x1xf32> to vector<8x8xf32>
    %28 = arith.subf %20, %27 : vector<8x8xf32>
    %29 = math.exp %28 : vector<8x8xf32>
    %cst_13 = arith.constant dense<0.000000e+00> : vector<8xf32>
    %30 = vector.multi_reduction <add>, %29, %cst_13 [1] : vector<8x8xf32> to vector<8xf32>
    %31 = vector.shape_cast %30 : vector<8xf32> to vector<8x1xf32>
    %cst_14 = arith.constant 1.000000e+00 : f32
    %32 = vector.broadcast %cst_14 : f32 to vector<8x1xf32>
    %33 = arith.select %24, %31, %32 : vector<8x1xi1>, vector<8x1xf32>
    %34 = tpu.reciprocal %33 : vector<8x1xf32> -> vector<8x1xf32>
    %35 = vector.broadcast %34 : vector<8x1xf32> to vector<8x8xf32>
    %36 = arith.mulf %29, %35 : vector<8x8xf32>
    %cst_15 = arith.constant 0.000000e+00 : f32
    %37 = vector.shape_cast %24 : vector<8x1xi1> to vector<8x1xi1>
    %38 = vector.broadcast %37 : vector<8x1xi1> to vector<8x8xi1>
    %39 = vector.broadcast %cst_15 : f32 to vector<8x8xf32>
    %40 = arith.select %38, %36, %39 : vector<8x8xi1>, vector<8x8xf32>
    %cst_16 = arith.constant dense<0.000000e+00> : vector<8x8xf32>
    %41 = tpu.matmul %40, %11, %cst_16 {dimension_numbers = #tpu.dot_dimension_numbers<[1], [0], [0], [1], [0, 0, 1, 1], [], []>} : vector<8x8xf32>, vector<8x8xf32>, vector<8x8xf32> -> vector<8x8xf32>
    %42 = vector.extract_strided_slice %3 {offsets = [0, 8], sizes = [8, 8], strides = [1, 1]} : vector<8x96xf32> to vector<8x8xf32>
    %43 = vector.extract_strided_slice %3 {offsets = [0, 40], sizes = [8, 8], strides = [1, 1]} : vector<8x96xf32> to vector<8x8xf32>
    %44 = vector.extract_strided_slice %3 {offsets = [0, 72], sizes = [8, 8], strides = [1, 1]} : vector<8x96xf32> to vector<8x8xf32>
    %45 = tpu.transpose %43, [1, 0] : vector<8x8xf32> -> vector<8x8xf32>
    %cst_17 = arith.constant dense<0.000000e+00> : vector<8x8xf32>
    %46 = tpu.matmul %42, %45, %cst_17 {dimension_numbers = #tpu.dot_dimension_numbers<[1], [0], [0], [1], [0, 0, 1, 1], [], []>} : vector<8x8xf32>, vector<8x8xf32>, vector<8x8xf32> -> vector<8x8xf32>
    %47 = vector.broadcast %5 : vector<8x1xf32> to vector<8x8xf32>
    %48 = arith.mulf %47, %46 : vector<8x8xf32>
    %cst_18 = arith.constant 0.000000e+00 : f32
    %49 = vector.broadcast %cst_18 : f32 to vector<8x8xf32>
    %50 = arith.cmpf oeq, %48, %49 : vector<8x8xf32>
    %51 = arith.ori %8, %50 : vector<8x8xi1>
    %cst_19 = arith.constant 0xFF800000 : f32
    %52 = vector.broadcast %cst_19 : f32 to vector<8x8xf32>
    %53 = arith.select %51, %52, %48 : vector<8x8xi1>, vector<8x8xf32>
    %cst_20 = arith.constant dense<0xFF800000> : vector<8xf32>
    %54 = vector.multi_reduction <maximumf>, %53, %cst_20 [1] : vector<8x8xf32> to vector<8xf32>
    %55 = vector.shape_cast %54 : vector<8xf32> to vector<8x1xf32>
    %cst_21 = arith.constant 0xFF800000 : f32
    %56 = vector.broadcast %cst_21 : f32 to vector<8x1xf32>
    %57 = arith.cmpf ogt, %55, %56 : vector<8x1xf32>
    %cst_22 = arith.constant 0.000000e+00 : f32
    %58 = vector.broadcast %cst_22 : f32 to vector<8x1xf32>
    %59 = arith.select %57, %55, %58 : vector<8x1xi1>, vector<8x1xf32>
    %60 = vector.broadcast %59 : vector<8x1xf32> to vector<8x8xf32>
    %61 = arith.subf %53, %60 : vector<8x8xf32>
    %62 = math.exp %61 : vector<8x8xf32>
    %cst_23 = arith.constant dense<0.000000e+00> : vector<8xf32>
    %63 = vector.multi_reduction <add>, %62, %cst_23 [1] : vector<8x8xf32> to vector<8xf32>
    %64 = vector.shape_cast %63 : vector<8xf32> to vector<8x1xf32>
    %cst_24 = arith.constant 1.000000e+00 : f32
    %65 = vector.broadcast %cst_24 : f32 to vector<8x1xf32>
    %66 = arith.select %57, %64, %65 : vector<8x1xi1>, vector<8x1xf32>
    %67 = tpu.reciprocal %66 : vector<8x1xf32> -> vector<8x1xf32>
    %68 = vector.broadcast %67 : vector<8x1xf32> to vector<8x8xf32>
    %69 = arith.mulf %62, %68 : vector<8x8xf32>
    %cst_25 = arith.constant 0.000000e+00 : f32
    %70 = vector.shape_cast %57 : vector<8x1xi1> to vector<8x1xi1>
    %71 = vector.broadcast %70 : vector<8x1xi1> to vector<8x8xi1>
    %72 = vector.broadcast %cst_25 : f32 to vector<8x8xf32>
    %73 = arith.select %71, %69, %72 : vector<8x8xi1>, vector<8x8xf32>
    %cst_26 = arith.constant dense<0.000000e+00> : vector<8x8xf32>
    %74 = tpu.matmul %73, %44, %cst_26 {dimension_numbers = #tpu.dot_dimension_numbers<[1], [0], [0], [1], [0, 0, 1, 1], [], []>} : vector<8x8xf32>, vector<8x8xf32>, vector<8x8xf32> -> vector<8x8xf32>
    %75 = vector.extract_strided_slice %3 {offsets = [0, 16], sizes = [8, 8], strides = [1, 1]} : vector<8x96xf32> to vector<8x8xf32>
    %76 = vector.extract_strided_slice %3 {offsets = [0, 48], sizes = [8, 8], strides = [1, 1]} : vector<8x96xf32> to vector<8x8xf32>
    %77 = vector.extract_strided_slice %3 {offsets = [0, 80], sizes = [8, 8], strides = [1, 1]} : vector<8x96xf32> to vector<8x8xf32>
    %78 = tpu.transpose %76, [1, 0] : vector<8x8xf32> -> vector<8x8xf32>
    %cst_27 = arith.constant dense<0.000000e+00> : vector<8x8xf32>
    %79 = tpu.matmul %75, %78, %cst_27 {dimension_numbers = #tpu.dot_dimension_numbers<[1], [0], [0], [1], [0, 0, 1, 1], [], []>} : vector<8x8xf32>, vector<8x8xf32>, vector<8x8xf32> -> vector<8x8xf32>
    %80 = vector.broadcast %5 : vector<8x1xf32> to vector<8x8xf32>
    %81 = arith.mulf %80, %79 : vector<8x8xf32>
    %cst_28 = arith.constant 0.000000e+00 : f32
    %82 = vector.broadcast %cst_28 : f32 to vector<8x8xf32>
    %83 = arith.cmpf oeq, %81, %82 : vector<8x8xf32>
    %84 = arith.ori %8, %83 : vector<8x8xi1>
    %cst_29 = arith.constant 0xFF800000 : f32
    %85 = vector.broadcast %cst_29 : f32 to vector<8x8xf32>
    %86 = arith.select %84, %85, %81 : vector<8x8xi1>, vector<8x8xf32>
    %cst_30 = arith.constant dense<0xFF800000> : vector<8xf32>
    %87 = vector.multi_reduction <maximumf>, %86, %cst_30 [1] : vector<8x8xf32> to vector<8xf32>
    %88 = vector.shape_cast %87 : vector<8xf32> to vector<8x1xf32>
    %cst_31 = arith.constant 0xFF800000 : f32
    %89 = vector.broadcast %cst_31 : f32 to vector<8x1xf32>
    %90 = arith.cmpf ogt, %88, %89 : vector<8x1xf32>
    %cst_32 = arith.constant 0.000000e+00 : f32
    %91 = vector.broadcast %cst_32 : f32 to vector<8x1xf32>
    %92 = arith.select %90, %88, %91 : vector<8x1xi1>, vector<8x1xf32>
    %93 = vector.broadcast %92 : vector<8x1xf32> to vector<8x8xf32>
    %94 = arith.subf %86, %93 : vector<8x8xf32>
    %95 = math.exp %94 : vector<8x8xf32>
    %cst_33 = arith.constant dense<0.000000e+00> : vector<8xf32>
    %96 = vector.multi_reduction <add>, %95, %cst_33 [1] : vector<8x8xf32> to vector<8xf32>
    %97 = vector.shape_cast %96 : vector<8xf32> to vector<8x1xf32>
    %cst_34 = arith.constant 1.000000e+00 : f32
    %98 = vector.broadcast %cst_34 : f32 to vector<8x1xf32>
    %99 = arith.select %90, %97, %98 : vector<8x1xi1>, vector<8x1xf32>
    %100 = tpu.reciprocal %99 : vector<8x1xf32> -> vector<8x1xf32>
    %101 = vector.broadcast %100 : vector<8x1xf32> to vector<8x8xf32>
    %102 = arith.mulf %95, %101 : vector<8x8xf32>
    %cst_35 = arith.constant 0.000000e+00 : f32
    %103 = vector.shape_cast %90 : vector<8x1xi1> to vector<8x1xi1>
    %104 = vector.broadcast %103 : vector<8x1xi1> to vector<8x8xi1>
    %105 = vector.broadcast %cst_35 : f32 to vector<8x8xf32>
    %106 = arith.select %104, %102, %105 : vector<8x8xi1>, vector<8x8xf32>
    %cst_36 = arith.constant dense<0.000000e+00> : vector<8x8xf32>
    %107 = tpu.matmul %106, %77, %cst_36 {dimension_numbers = #tpu.dot_dimension_numbers<[1], [0], [0], [1], [0, 0, 1, 1], [], []>} : vector<8x8xf32>, vector<8x8xf32>, vector<8x8xf32> -> vector<8x8xf32>
    %108 = vector.extract_strided_slice %3 {offsets = [0, 24], sizes = [8, 8], strides = [1, 1]} : vector<8x96xf32> to vector<8x8xf32>
    %109 = vector.extract_strided_slice %3 {offsets = [0, 56], sizes = [8, 8], strides = [1, 1]} : vector<8x96xf32> to vector<8x8xf32>
    %110 = vector.extract_strided_slice %3 {offsets = [0, 88], sizes = [8, 8], strides = [1, 1]} : vector<8x96xf32> to vector<8x8xf32>
    %111 = tpu.transpose %109, [1, 0] : vector<8x8xf32> -> vector<8x8xf32>
    %cst_37 = arith.constant dense<0.000000e+00> : vector<8x8xf32>
    %112 = tpu.matmul %108, %111, %cst_37 {dimension_numbers = #tpu.dot_dimension_numbers<[1], [0], [0], [1], [0, 0, 1, 1], [], []>} : vector<8x8xf32>, vector<8x8xf32>, vector<8x8xf32> -> vector<8x8xf32>
    %113 = vector.broadcast %5 : vector<8x1xf32> to vector<8x8xf32>
    %114 = arith.mulf %113, %112 : vector<8x8xf32>
    %cst_38 = arith.constant 0.000000e+00 : f32
    %115 = vector.broadcast %cst_38 : f32 to vector<8x8xf32>
    %116 = arith.cmpf oeq, %114, %115 : vector<8x8xf32>
    %117 = arith.ori %8, %116 : vector<8x8xi1>
    %cst_39 = arith.constant 0xFF800000 : f32
    %118 = vector.broadcast %cst_39 : f32 to vector<8x8xf32>
    %119 = arith.select %117, %118, %114 : vector<8x8xi1>, vector<8x8xf32>
    %cst_40 = arith.constant dense<0xFF800000> : vector<8xf32>
    %120 = vector.multi_reduction <maximumf>, %119, %cst_40 [1] : vector<8x8xf32> to vector<8xf32>
    %121 = vector.shape_cast %120 : vector<8xf32> to vector<8x1xf32>
    %cst_41 = arith.constant 0xFF800000 : f32
    %122 = vector.broadcast %cst_41 : f32 to vector<8x1xf32>
    %123 = arith.cmpf ogt, %121, %122 : vector<8x1xf32>
    %cst_42 = arith.constant 0.000000e+00 : f32
    %124 = vector.broadcast %cst_42 : f32 to vector<8x1xf32>
    %125 = arith.select %123, %121, %124 : vector<8x1xi1>, vector<8x1xf32>
    %126 = vector.broadcast %125 : vector<8x1xf32> to vector<8x8xf32>
    %127 = arith.subf %119, %126 : vector<8x8xf32>
    %128 = math.exp %127 : vector<8x8xf32>
    %cst_43 = arith.constant dense<0.000000e+00> : vector<8xf32>
    %129 = vector.multi_reduction <add>, %128, %cst_43 [1] : vector<8x8xf32> to vector<8xf32>
    %130 = vector.shape_cast %129 : vector<8xf32> to vector<8x1xf32>
    %cst_44 = arith.constant 1.000000e+00 : f32
    %131 = vector.broadcast %cst_44 : f32 to vector<8x1xf32>
    %132 = arith.select %123, %130, %131 : vector<8x1xi1>, vector<8x1xf32>
    %133 = tpu.reciprocal %132 : vector<8x1xf32> -> vector<8x1xf32>
    %134 = vector.broadcast %133 : vector<8x1xf32> to vector<8x8xf32>
    %135 = arith.mulf %128, %134 : vector<8x8xf32>
    %cst_45 = arith.constant 0.000000e+00 : f32
    %136 = vector.shape_cast %123 : vector<8x1xi1> to vector<8x1xi1>
    %137 = vector.broadcast %136 : vector<8x1xi1> to vector<8x8xi1>
    %138 = vector.broadcast %cst_45 : f32 to vector<8x8xf32>
    %139 = arith.select %137, %135, %138 : vector<8x8xi1>, vector<8x8xf32>
    %cst_46 = arith.constant dense<0.000000e+00> : vector<8x8xf32>
    %140 = tpu.matmul %139, %110, %cst_46 {dimension_numbers = #tpu.dot_dimension_numbers<[1], [0], [0], [1], [0, 0, 1, 1], [], []>} : vector<8x8xf32>, vector<8x8xf32>, vector<8x8xf32> -> vector<8x8xf32>
    %141 = tpu.concatenate %41, %74, %107, %140 in 1 : vector<8x8xf32>, vector<8x8xf32>, vector<8x8xf32>, vector<8x8xf32> -> vector<8x32xf32>
    %c0_47 = arith.constant 0 : index
    %c0_48 = arith.constant 0 : index
    %142 = vector.load %arg4[%c0_47, %c0_48] : memref<32x32xf32, #tpu.memory_space<vmem>>, vector<32x32xf32>
    %cst_49 = arith.constant dense<0.000000e+00> : vector<8x32xf32>
    %143 = tpu.matmul %141, %142, %cst_49 {dimension_numbers = #tpu.dot_dimension_numbers<[1], [0], [0], [1], [0, 0, 1, 1], [], []>} : vector<8x32xf32>, vector<32x32xf32>, vector<8x32xf32> -> vector<8x32xf32>
    %c0_50 = arith.constant 0 : index
    %c0_51 = arith.constant 0 : index
    %144 = vector.load %arg5[%c0_50, %c0_51] : memref<1x32xf32, #tpu.memory_space<vmem>>, vector<1x32xf32>
    %145 = vector.broadcast %144 : vector<1x32xf32> to vector<8x32xf32>
    %146 = arith.addf %143, %145 : vector<8x32xf32>
    %c0_52 = arith.constant 0 : index
    %c0_53 = arith.constant 0 : index
    %c0_54 = arith.constant 0 : index
    %147 = vector.load %arg6[%c0_52, %c0_53, %c0_54] : memref<1x8x32xf32, #tpu.memory_space<vmem>>, vector<1x8x32xf32>
    %148 = vector.shape_cast %147 : vector<1x8x32xf32> to vector<8x32xf32>
    %149 = vector.shape_cast %146 : vector<8x32xf32> to vector<1x8x32xf32>
    tpu.vector_store %arg6[%c0_52, %c0_53, %c0_54], %149 {strides = array<i32>} : memref<1x8x32xf32, #tpu.memory_space<vmem>>, vector<1x8x32xf32>,
    return
  }
  func.func @transform_0(%arg0: i32) -> (i32, i32, i32) {
    %c0_i32 = arith.constant 0 : i32
    %c0_i32_0 = arith.constant 0 : i32
    %c0_i32_1 = arith.constant 0 : i32
    return %arg0, %c0_i32, %c0_i32_0 : i32, i32, i32
  }
  func.func @transform_1(%arg0: i32) -> (i32, i32, i32) {
    %c0_i32 = arith.constant 0 : i32
    %c0_i32_0 = arith.constant 0 : i32
    %c0_i32_1 = arith.constant 0 : i32
    return %arg0, %c0_i32, %c0_i32_0 : i32, i32, i32
  }
  func.func @transform_2(%arg0: i32) -> (i32, i32) {
    %c0_i32 = arith.constant 0 : i32
    %c0_i32_0 = arith.constant 0 : i32
    %c0_i32_1 = arith.constant 0 : i32
    return %c0_i32, %c0_i32_0 : i32, i32
  }
  func.func @transform_3(%arg0: i32) -> (i32, i32) {
    %c0_i32 = arith.constant 0 : i32
    %c0_i32_0 = arith.constant 0 : i32
    %c0_i32_1 = arith.constant 0 : i32
    return %c0_i32, %c0_i32_0 : i32, i32
  }
  func.func @transform_4(%arg0: i32) -> (i32, i32) {
    %c0_i32 = arith.constant 0 : i32
    %c0_i32_0 = arith.constant 0 : i32
    %c0_i32_1 = arith.constant 0 : i32
    return %c0_i32, %c0_i32_0 : i32, i32
  }
  func.func @transform_5(%arg0: i32) -> (i32, i32, i32) {
    %c0_i32 = arith.constant 0 : i32
    %c0_i32_0 = arith.constant 0 : i32
    %c0_i32_1 = arith.constant 0 : i32
    return %arg0, %c0_i32, %c0_i32_0 : i32, i32, i32
  }
}

</mosaic_0001>

<bundles_post_ra>
// kernel: tpu_custom_call.1
= control target key start
LH: loop header
LB: loop body
LE: loop exit
PB: predicated region body
PF: predicated region fallthrough
CT: control target
= control target key end

     0   :  { %10 = vsyncpa [#allocation3], 0  ;;  %s1914_s0 = inlined_call_operand.vmem [shape: f32[2,8,32], index: 0, kind: input, shape index: {}]   ;;  %s1915_s1 = inlined_call_operand.vmem [shape: f32[2,8,1], index: 1, kind: input, shape index: {}]   ;;  %s1916_s2 = inlined_call_operand.hbm [shape: f32[32,96], index: 2, kind: input, shape index: {}]   ;;  %s1917_s3 = inlined_call_operand.hbm [shape: f32[32,32], index: 3, kind: input, shape index: {}]   ;;  %s1918_s4 = inlined_call_operand.vmem [shape: f32[1,32], index: 4, kind: input, shape index: {}]   ;;  %s1919_s5 = inlined_call_operand.hbm [shape: f32[2,8,32], index: 5, kind: output, shape index: {}]  }
   0x1   :  { %11 = vsyncpa [#allocation6], 0 }
   0x2   :  { %12 = vsyncpa [#allocation4], 0 }
   0x3   :  { %14 = vsyncpa [#allocation4 + $0x1], 0  ;;  %s1654_s18 = smov 0   ;;  %s1656_s19 = smov 0  }
   0x4   :  { %s1658_s20 = smov 0   ;;  %s1660_s21 = smov 0  }
   0x5 LB: > { %s1675_s22 = sadd.s32 4294967295, %s1600_s21   ;;  %s1266_s23 = sadd.s32 4294967294, %s1600_s21   ;;  %s1600_s21 = sphi %s1660_s21, %s1933_s21   ;;  %s1596_s20 = sphi %s1658_s20, %s1932_s20   ;;  %s1592_s19 = sphi %s1656_s19, %s1931_s19   ;;  %s1588_s18 = sphi %s1654_s18, %s1930_s18  }
   0x6   : > { %s1679_s24 = sadd.s32 1, %s1600_s21   ;;  %s142_s25 = sadd.s32 1, %s1596_s20 }
   0x7   : > { %s139_s26 = ssub.s32 %s1600_s21, %s1679_s24  ;;  %p152_p0 = scmp.ne.s32.totalorder %s1596_s20, %s1592_s19 }
   0x8   : > { %p140_p1 = scmp.eq.s32.totalorder %s139_s26, 0  ;;  %p153_p2 = scmp.eq.s32.totalorder %s1675_s22, 1 }
   0x9   : > { %p158_p3 = scmp.ne.s32.totalorder %s1592_s19, %s1588_s18  ;;  %p159_p4 = scmp.eq.s32.totalorder %s1266_s23, 1 }
   0xa   : > { %s1690_s27 = scalar_select %p140_p1, %s1596_s20, %s142_s25  }
   0xb   : > { %p1692_p5 = por %p153_p2, %p152_p0  ;;  %p1696_p6 = por %p159_p4, %p158_p3 }
   0xc   : > { %p1267_p7 = scmp.ge.s32.totalorder %s1600_s21, 1  ;;  %p166_p8 = scmp.lt.s32.totalorder %s1600_s21, 3 }
   0xd   : > { %s1922_s29 = scalar_select %p1696_p6, 1, 0 }
   0xe   : > { %p1920_p9 = scmp.eq.s32.totalorder %s1675_s22, 0  ;;  %p1703_p10 = pnand %p1267_p7, %p166_p8 }
   0xf   : > { %s1602_s6 = smov [#allocation2]   ;;  %s1603_s9 = smov [#allocation5]  }
  0x10   : > { %s178_s7 = sshll.u32 %s1602_s6, 4  ;;  %p1394_p11 = pneg %p1703_p10  ;;  %s179_s7 = int_to_ptr.vmem [resolvable:$true] %s178_s7 }
  0x11   : > { %s191_s10 = sshll.u32 %s1603_s9, 4  ;;  %s1491_s11 = scalar_lea.vmem %s179_s7, 512  ;;  %s192_s10 = int_to_ptr.vmem [resolvable:$true] %s191_s10 }
  0x12   : > { %p1711_p12 = pnand %p1920_p9, %p1394_p11  ;;  %p1492_p0 = scmp.ne.s32.totalorder %s179_s7, %s1491_s11 }
  0x13   : > { %p1499_p3 = scmp.lt.s32.totalorder %s179_s7, %s179_s7  ;;  %p1500_p4 = scmp.lt.s32.totalorder %s1491_s11, %s1491_s11 }
  0x14   : > { %p1482_p13 = pneg %p1711_p12 }
  0x15   : > { %p1501_p7 = por %p1500_p4, %p1499_p3 }
  0x16   : > { %p1494_p1 = pnand %p1492_p0, %p1482_p13 }
  0x18   : > { %p1495_p2 = pneg %p1494_p1 }
  0x1a   : > { %p1502_p8 = pnand %p1501_p7, %p1495_p2 }
  0x1c   : > { %1505 = shalt.err (!%p1502_p8)
}
  0x1d   : > { %s1604_s12 = smov 128   ;;  %s1605_s13 = smov 8  }
  0x1e   : > { %1397 = dma.hbm_to_vmem [thread:$0]  (!%p1711_p12), %s1916_s2, 512, %s179_s7, [#allocation3], %s1604_s12, %s1604_s12, %s1605_s13  }
  0x1f   : > { %s1517_s16 = scalar_lea.vmem %s192_s10, 512  ;;  %p1525_p9 = scmp.lt.s32.totalorder %s192_s10, %s192_s10 }
  0x20   : > { %p1518_p11 = scmp.ne.s32.totalorder %s192_s10, %s1517_s16  ;;  %p1526_p6 = scmp.lt.s32.totalorder %s1517_s16, %s1517_s16 }
  0x22   : > { %p1520_p0 = pnand %p1518_p11, %p1482_p13  ;;  %p1527_p3 = por %p1526_p6, %p1525_p9 }
  0x24   : > { %p1521_p1 = pneg %p1520_p0 }
  0x26   : > { %p1528_p2 = pnand %p1527_p3, %p1521_p1 }
  0x28   : > { %1531 = shalt.err (!%p1528_p2)
}
  0x29   : > { %1400 = dma.hbm_to_vmem [thread:$0]  (!%p1711_p12), %s1917_s3, 512, %s192_s10, [#allocation6], %s1604_s12, %s1604_s12, %s1605_s13  }
  0x2a   : > { %224 = sbr.rel (%p1703_p10) target bundleno = 1929 (0x789), region = 40  ;;  %p1925_p4 = scmp.eq.s32.totalorder (!%p1703_p10), %s1675_s22, 0 }
  0x2f   : > { %1575 = dma.done.wait (%p1925_p4), [#allocation3], 512   ;;  %p1926_p13 = pmov %p1925_p4 }
  0x30   : > { %p1927_p7 = pmov %p1925_p4 }
  0x31   : > { %1577 = vsyncadd (%p1926_p13), [#allocation3], 4294966784 }
  0x32   : > { %1579 = dma.done.wait (%p1927_p7), [#allocation6], 512   ;;  %p1928_p6 = pmov %p1925_p4 }
  0x33   : > { %p259_p9 = scmp.lt.s32.totalorder %s1675_s22, 1  ;;  %v1606_v0 = vmov 0.0   ;;  %vm1607_vm0 = vmmov 0   ;;  %v271_v1 = vld [vmem:[#allocation2 + $0x18] sm:$0xff]  ;;  %v270_v2 = vld [vmem:[#allocation2 + $0x10] sm:$0xff]  ;;  %v269_v3 = vld [vmem:[#allocation2 + $0x8] sm:$0xff]  ;;  %v347_v16 = vlaneseq }
  0x34   : > { %1581 = vsyncadd (%p1928_p6), [#allocation6], 4294966784  ;;  %1322 = vmatprep.subr.mxu0 %v1606_v0  ;;  %1330 = vmatprep.mubr.msk.f32.mxu0 %vm1607_vm0, %v1606_v0  ;;  %v268_v4 = vld [vmem:[#allocation2] sm:$0xff]  ;;  %vm272_vm1 = vcmask 261120   ;;  %v1608_v6 = vmov 0   ;;  %s1609_s11 = smov 96  }
  0x35   : > { %s260_s25 = scalar_select %p259_p9, %s1675_s22, 1  ;;  %1333 = vmatprep.subr.mxu1 %v1606_v0  ;;  %1335 = vmatprep.mubr.msk.f32.mxu1 %vm1607_vm0, %v1606_v0  ;;  %vm355_vm2 = vcmask 64512   ;;  %v1785_v17 = vshrl.u32 %v347_v16, 7  ;;  %v1787_v18 = vand.u32 127, %v347_v16 }
  0x36   : > { %1323 = vmatpush3.msra.mxu0 %v271_v1  ;;  %1463 = vset.pattern.permute.xlu0 %v1608_v6  ;;  %s1610_s12 = smov 88   ;;  %s1611_s13 = smov 120  }
  0x37   : > { %s1275_s26 = sshll.u32 %s260_s25, 3  ;;  %1324 = vmatprep.subr.mxu0 %v1606_v0  ;;  %s1612_s14 = smov 80   ;;  %vm351_vm3 = vcmp.gt.s32.totalorder %v1787_v18, %v1785_v17 }
  0x38   : > { %s262_s7 = scalar_lea.vmem %s1914_s0, %s1275_s26  ;;  %1325 = vmatpush3.msra.mxu0 %v270_v2  ;;  %s266_s10 = scalar_lea.vmem %s1915_s1, %s1275_s26 }
  0x39   : > { %1326 = vmatprep.subr.mxu0 %v1606_v0  ;;  %v267_v5 = vld [vmem:[%s262_s7] sm:$0xff]  ;;  %s1613_s15 = smov 112   ;;  %s1614_s16 = smov 104  }
  0x3a   : > { %1327 = vmatpush3.msra.mxu0 %v269_v3  ;;  %v346_v9 = vld [vmem:[%s266_s10] sm:$0xff]  ;;  %s1615_s17 = smov 64   ;;  %s1616_s23 = smov 72  }
  0x3b   : > { %1328 = vmatprep.subr.mxu0 %v1606_v0  ;;  %s1617_s25 = smov 56   ;;  %s1618_s26 = smov 48  }
  0x3c   : > { %1329 = vmatpush3.msra.mxu0 %v268_v4  ;;  %s1619_s30 = smov 40   ;;  %s1620_s6 = smov 8  }
  0x3d   : > { %1331 = vmatmul.mubr.msk.f32.vlgmr.msra.gmra.mxu0 %vm272_vm1, %v267_v5  ;;  %1353 = vmatprep.subr.mxu0 %v1606_v0  ;;  %s1621_s7 = smov 16   ;;  %s1622_s8 = smov 24  }
  0x3e   : > { %1355 = vmatprep.mubr.msk.f32.mxu0 %vm1607_vm0, %v1606_v0  ;;  %s256_s9 = sand.u32 1, %s1592_s19  }
  0x3f   : > { %s1274_s10 = sshll.u32 %s256_s9, 3 }
  0xfd   : > { %v1764_v7 = vpop.f32.mrf.mxu0 }
  0xfe   : > { %353 = vrot.lane.b32.xlu0 %v1764_v7, %s1609_s11 }
  0xff   : > { %v1332_v8 = vpop.f32.mrf.mxu0 }
 0x102   : > { %432 = vperm.xlu0 %1463, %v346_v9  }
 0x106   : > { %534 = vrot.lane.b32.xlu0 %v1764_v7, %s1610_s12 }
 0x10a   : > { %532 = vrot.lane.b32.xlu0 %v1764_v7, %s1611_s13  ;;  %s1293_s13 = sshll.u32 %s1675_s22, 7  ;;  %s1623_s22 = smov [#allocation7]  }
 0x10e   : > { %709 = vrot.lane.b32.xlu0 %v1764_v7, %s1612_s14  ;;  %s258_s14 = scalar_lea.vmem [#allocation7], %s1274_s10 }
 0x112   : > { %707 = vrot.lane.b32.xlu0 %v1764_v7, %s1613_s15  ;;  %s1173_s15 = sshll.u32 %s258_s14, 4  ;;  %s1174_s15 = int_to_ptr.vmem [resolvable:$true] %s1173_s15 }
 0x116   : > { %882 = vrot.lane.b32.xlu0 %v1764_v7, %s1614_s16 }
 0x170   : > { %v354_v10 = vpop.permute.xlu0 %353 }
 0x171   : > { %1334 = vmatpush3.xpose.msk.msra.mxu1 %vm355_vm2, %v354_v10 }
 0x172   : > { %1338 = vmatprep.subr.mxu1 %v1606_v0 }
 0x174   : > { %1336 = vmatmul.mubr.msk.f32.vlgmr.msra.gmra.mxu1 %vm355_vm2, %v1764_v7 }
 0x175   : > { %1340 = vmatprep.mubr.msk.f32.mxu1 %vm1607_vm0, %v1606_v0 }
 0x17d   : > { %v1778_v11 = vpop.permute.xlu0 %432 }
 0x181   : > { %v535_v12 = vpop.permute.xlu0 %534 }
 0x185   : > { %v533_v13 = vpop.permute.xlu0 %532 }
 0x189   : > { %v710_v14 = vpop.permute.xlu0 %709 }
 0x18a   : > { %1354 = vmatpush3.xpose.msk.msra.mxu0 %vm355_vm2, %v710_v14 }
 0x18b   : > { %1363 = vmatprep.subr.mxu0 %v1606_v0 }
 0x18d   : > { %v708_v15 = vpop.permute.xlu0 %707 }
 0x18e   : > { %1356 = vmatmul.mubr.msk.f32.vlgmr.msra.gmra.mxu0 %vm355_vm2, %v708_v15 }
 0x18f   : > { %1365 = vmatprep.mubr.msk.f32.mxu0 %vm1607_vm0, %v1606_v0 }
 0x191   : > { %v883_v39 = vpop.permute.xlu0 %882 }
 0x234   : > { %v426_v19 = vpop.f32.mrf.mxu1 }
 0x235   : > { %v435_v20 = vmul.f32 %v1778_v11, %v426_v19 }
 0x236   : > { %v1337_v21 = vpop.f32.mrf.mxu1 }
 0x237   : > { %vm436_vm4 = vcmp.eq.f32.partialorder %v435_v20, 0.0 }
 0x238   : > { %vm437_vm5 = vmor %vm351_vm3, %vm436_vm4 }
 0x239   : > { %v438_v22 = vsel %vm437_vm5, -inf, %v435_v20 }
 0x23a   : > { %v439_v23 = vsel %vm355_vm2, %v438_v22, -inf }
 0x23b   : > { %440 = vmax.xlane.f32.xlu1 %v439_v23 }
 0x24e   : > { %v781_v24 = vpop.f32.mrf.mxu0 }
 0x24f   : > { %v785_v25 = vmul.f32 %v781_v24, %v1778_v11 }
 0x250   : > { %v1357_v26 = vpop.f32.mrf.mxu0 }
 0x251   : > { %vm786_vm6 = vcmp.eq.f32.partialorder %v785_v25, 0.0 }
 0x252   : > { %vm787_vm7 = vmor %vm351_vm3, %vm786_vm6 }
 0x253   : > { %v788_v27 = vsel %vm787_vm7, -inf, %v785_v25 }
 0x254   : > { %v789_v28 = vsel %vm355_vm2, %v788_v27, -inf }
 0x255   : > { %790 = vmax.xlane.f32.xlu0 %v789_v28  ;;  %v1077_v28 = vld [vmem:[#allocation5 + $0x18] sm:$0xff] }
 0x2c4   : > { %v441_v29 = vpop.xlane.xlu1 %440 }
 0x2c5   : > { %vm442_vm8 = vcmp.gt.f32.partialorder %v441_v29, -inf }
 0x2c6   : > { %v443_v30 = vsel %vm442_vm8, %v441_v29, 0.0  ;;  %v1076_v29 = vld [vmem:[#allocation5 + $0x10] sm:$0xff] }
 0x2c7   : > { %v444_v31 = vsub.f32 %v438_v22, %v443_v30  ;;  %v1075_v30 = vld [vmem:[#allocation5 + $0x8] sm:$0xff] }
 0x2c9   : > { %v445_v32 = vmul.f32 1.442695, %v444_v31  ;;  %v1074_v31 = vld [vmem:[#allocation5] sm:$0xff] }
 0x2cb   : > { %1464 = vpow2.f32 %v445_v32 }
 0x2d8   : > { %v1465_v33 = vpop.eup %1464 }
 0x2d9   : > { %v447_v34 = vsel %vm355_vm2, %v1465_v33, 0.0 }
 0x2da   : > { %448 = vadd.xlane.f32.xlu1 %v447_v34 }
 0x2de   : > { %v1821_v43 = vpop.xlane.xlu0 %790 }
 0x2df   : > { %vm792_vm9 = vcmp.gt.f32.partialorder %v1821_v43, -inf }
 0x2e0   : > { %v793_v44 = vsel %vm792_vm9, %v1821_v43, 0.0  ;;  %v1290_v43 = vld [vmem:[%s1918_s4] ss:$0 sm:$0xff] }
 0x2e1   : > { %v794_v45 = vsub.f32 %v788_v27, %v793_v44 }
 0x2e3   : > { %v795_v46 = vmul.f32 1.442695, %v794_v45 }
 0x2eb   : > { %456 = vrot.lane.b32.xlu1 %v1764_v7, %s1615_s17 }
 0x2ef   : > { %884 = vrot.lane.b32.xlu1 %v1764_v7, %s1616_s23  ;;  %s1878_s23 = scalar_lea.hbm %s1919_s5, %s1293_s13 }
 0x363   : > { %v449_v35 = vpop.xlane.xlu1 %448 }
 0x364   : > { %v450_v36 = vsel %vm442_vm8, %v449_v35, 1.0 }
 0x365   : > { %1466 = vrcp.f32 %v450_v36 }
 0x366   : > { %1468 = vpow2.f32 %v795_v46 }
 0x367   : > { %v457_v37 = vpop.permute.xlu1 %456 }
 0x368   : > { %1339 = vmatpush3.msra.mxu1 %v457_v37 }
 0x369   : > { %1343 = vmatprep.subr.mxu1 %v1606_v0 }
 0x36b   : > { %v885_v38 = vpop.permute.xlu1 %884 }
 0x36c   : > { %1364 = vmatpush3.xpose.msk.msra.mxu0 %vm355_vm2, %v885_v38 }
 0x36d   : > { %1373 = vmatprep.subr.mxu0 %v1606_v0 }
 0x36f   : > { %1366 = vmatmul.mubr.msk.f32.vlgmr.msra.gmra.mxu0 %vm355_vm2, %v883_v39 }
 0x370   : > { %1381 = vmatprep.mubr.msk.f32.mxu0 %vm1607_vm0, %v1606_v0  ;;  %1374 = vmatpush3.msra.mxu0 %v1077_v28 }
 0x371   : > { %1375 = vmatprep.subr.mxu0 %v1606_v0 }
 0x372   : > { %v1467_v40 = vpop.eup %1466  ;;  %1376 = vmatpush3.msra.mxu0 %v1076_v29 }
 0x373   : > { %v452_v41 = vmul.f32 %v1467_v40, %v1465_v33  ;;  %v1469_v52 = vpop.eup %1468  ;;  %1377 = vmatprep.subr.mxu0 %v1606_v0 }
 0x374   : > { %v797_v55 = vsel %vm355_vm2, %v1469_v52, 0.0  ;;  %1378 = vmatpush3.msra.mxu0 %v1075_v30 }
 0x375   : > { %v455_v42 = vsel %vm442_vm8, %v452_v41, 0.0  ;;  %1379 = vmatprep.subr.mxu0 %v1606_v0 }
 0x376   : > { %1341 = vmatmul.mubr.msk.f32.vlgmr.msra.gmra.mxu1 %vm355_vm2, %v455_v42  ;;  %1380 = vmatpush3.msra.mxu0 %v1074_v31 }
 0x377   : > { %1344 = vmatpush3.xpose.msk.msra.mxu1 %vm355_vm2, %v535_v12  ;;  %1345 = vmatprep.mubr.msk.f32.mxu1 %vm1607_vm0, %v1606_v0 }
 0x378   : > { %1348 = vmatprep.subr.mxu1 %v1606_v0 }
 0x37a   : > { %1346 = vmatmul.mubr.msk.f32.vlgmr.msra.gmra.mxu1 %vm355_vm2, %v533_v13 }
 0x37b   : > { %1350 = vmatprep.mubr.msk.f32.mxu1 %vm1607_vm0, %v1606_v0 }
 0x42f   : > { %v956_v47 = vpop.f32.mrf.mxu0 }
 0x430   : > { %v960_v48 = vmul.f32 %v956_v47, %v1778_v11 }
 0x431   : > { %v1367_v49 = vpop.f32.mrf.mxu0 }
 0x432   : > { %vm961_vm10 = vcmp.eq.f32.partialorder %v960_v48, 0.0 }
 0x433   : > { %vm962_vm11 = vmor %vm351_vm3, %vm961_vm10 }
 0x434   : > { %v963_v50 = vsel %vm962_vm11, -inf, %v960_v48 }
 0x435   : > { %v964_v51 = vsel %vm355_vm2, %v963_v50, -inf }
 0x436   : > { %v1832_v53 = vpop.f32.mrf.mxu1  ;;  %965 = vmax.xlane.f32.xlu0 %v964_v51 }
 0x438   : > { %v1342_v54 = vpop.f32.mrf.mxu1 }
 0x43a   : > { %v606_v56 = vpop.f32.mrf.mxu1  ;;  %798 = vadd.xlane.f32.xlu0 %v797_v55 }
 0x43b   : > { %v610_v57 = vmul.f32 %v606_v56, %v1778_v11 }
 0x43c   : > { %v1347_v58 = vpop.f32.mrf.mxu1 }
 0x43d   : > { %vm611_vm12 = vcmp.eq.f32.partialorder %v610_v57, 0.0 }
 0x43e   : > { %vm612_vm13 = vmor %vm351_vm3, %vm611_vm12  ;;  %vm1072_vm3 = vcmask 195584  }
 0x43f   : > { %v613_v59 = vsel %vm612_vm13, -inf, %v610_v57 }
 0x440   : > { %v614_v60 = vsel %vm355_vm2, %v613_v59, -inf }
 0x441   : > { %615 = vmax.xlane.f32.xlu1 %v614_v60 }
 0x450   : > { %631 = vrot.lane.b32.xlu0 %v1764_v7, %s1617_s25  ;;  %s1160_s25 = scalar_lea.sflag [#allocation4], %s256_s9 }
 0x4bf   : > { %v966_v61 = vpop.xlane.xlu0 %965 }
 0x4c0   : > { %vm967_vm14 = vcmp.gt.f32.partialorder %v966_v61, -inf }
 0x4c1   : > { %v968_v62 = vsel %vm967_vm14, %v966_v61, 0.0 }
 0x4c2   : > { %v969_v63 = vsub.f32 %v963_v50, %v968_v62 }
 0x4c3   : > { %v799_v1 = vpop.xlane.xlu0 %798 }
 0x4c4   : > { %v970_v2 = vmul.f32 1.442695, %v969_v63  ;;  %v800_v14 = vsel %vm792_vm9, %v799_v1, 1.0 }
 0x4c6   : > { %1470 = vpow2.f32 %v970_v2 }
 0x4c7   : > { %v632_v3 = vpop.permute.xlu0 %631 }
 0x4c8   : > { %1349 = vmatpush3.msra.mxu1 %v632_v3 }
 0x4c9   : > { %1358 = vmatprep.subr.mxu1 %v1606_v0 }
 0x4ca   : > { %v616_v4 = vpop.xlane.xlu1 %615 }
 0x4cb   : > { %vm617_vm15 = vcmp.gt.f32.partialorder %v616_v4, -inf }
 0x4cc   : > { %v618_v5 = vsel %vm617_vm15, %v616_v4, 0.0 }
 0x4cd   : > { %v619_v6 = vsub.f32 %v613_v59, %v618_v5 }
 0x4cf   : > { %v620_v8 = vmul.f32 1.442695, %v619_v6 }
 0x4d1   : > { %1472 = vpow2.f32 %v620_v8 }
 0x4d2   : > { %1474 = vrcp.f32 %v800_v14 }
 0x4d3   : > { %v1471_v9 = vpop.eup %1470 }
 0x4d4   : > { %v972_v10 = vsel %vm355_vm2, %v1471_v9, 0.0 }
 0x4d5   : > { %973 = vadd.xlane.f32.xlu1 %v972_v10 }
 0x4de   : > { %v1473_v11 = vpop.eup %1472 }
 0x4df   : > { %v622_v12 = vsel %vm355_vm2, %v1473_v11, 0.0  ;;  %v1475_v18 = vpop.eup %1474 }
 0x4e0   : > { %623 = vadd.xlane.f32.xlu1 %v622_v12  ;;  %v802_v23 = vmul.f32 %v1475_v18, %v1469_v52 }
 0x4e2   : > { %v805_v24 = vsel %vm792_vm9, %v802_v23, 0.0 }
 0x4f1   : > { %806 = vrot.lane.b32.xlu1 %v1764_v7, %s1618_s26  ;;  %s1532_s26 = scalar_lea.vmem %s1174_s15, 128 }
 0x4f2   : > { %p1533_p10 = scmp.ne.s32.totalorder %s1174_s15, %s1532_s26 }
 0x4f4   : > { %p1534_p12 = pnand %p1533_p10, %p1692_p5 }
 0x4f5   : > { %981 = vrot.lane.b32.xlu1 %v1764_v7, %s1619_s30  ;;  %s1536_s30 = sshll.u32 %s1623_s22, 4  ;;  %s1537_s30 = int_to_ptr.vmem [resolvable:$false] %s1536_s30 }
 0x4f6   : > { %p1535_p8 = pneg %p1534_p12  ;;  %p1539_p11 = scmp.lt.s32.totalorder %s1174_s15, %s1537_s30 }
 0x55e   : > { %v974_v13 = vpop.xlane.xlu1 %973 }
 0x55f   : > { %v975_v17 = vsel %vm967_vm14, %v974_v13, 1.0 }
 0x569   : > { %v624_v15 = vpop.xlane.xlu1 %623 }
 0x56a   : > { %v625_v16 = vsel %vm617_vm15, %v624_v15, 1.0 }
 0x56b   : > { %1476 = vrcp.f32 %v625_v16 }
 0x56c   : > { %1478 = vrcp.f32 %v975_v17 }
 0x56d   : > { %v807_v21 = vpop.permute.xlu1 %806 }
 0x571   : > { %v982_v26 = vpop.permute.xlu1 %981 }
 0x578   : > { %v1477_v19 = vpop.eup %1476 }
 0x579   : > { %v627_v20 = vmul.f32 %v1477_v19, %v1473_v11  ;;  %v1479_v7 = vpop.eup %1478 }
 0x57a   : > { %v977_v25 = vmul.f32 %v1479_v7, %v1471_v9 }
 0x57b   : > { %v630_v22 = vsel %vm617_vm15, %v627_v20, 0.0 }
 0x57c   : > { %1351 = vmatmul.mubr.msk.f32.vlgmr.msra.gmra.mxu1 %vm355_vm2, %v630_v22  ;;  %v980_v27 = vsel %vm967_vm14, %v977_v25, 0.0 }
 0x57d   : > { %1359 = vmatpush3.msra.mxu1 %v807_v21  ;;  %1360 = vmatprep.mubr.msk.f32.mxu1 %vm1607_vm0, %v1606_v0 }
 0x57e   : > { %1368 = vmatprep.subr.mxu1 %v1606_v0 }
 0x580   : > { %1361 = vmatmul.mubr.msk.f32.vlgmr.msra.gmra.mxu1 %vm355_vm2, %v805_v24 }
 0x581   : > { %1369 = vmatpush3.msra.mxu1 %v982_v26  ;;  %1370 = vmatprep.mubr.msk.f32.mxu1 %vm1607_vm0, %v1606_v0  ;;  %vm1070_vm0 = vcmask 130048  }
 0x584   : > { %1371 = vmatmul.mubr.msk.f32.vlgmr.msra.gmra.mxu1 %vm355_vm2, %v980_v27 }
 0x63c   : > { %v703_v32 = vpop.f32.mrf.mxu1 }
 0x63d   : > { %1058 = vrot.lane.b32.xlu0 %v703_v32, %s1620_s6  ;;  %s1538_s6 = scalar_lea.vmem %s1537_s30, 256 }
 0x63e   : > { %v1352_v33 = vpop.f32.mrf.mxu1  ;;  %p1540_p0 = scmp.lt.s32.totalorder %s1538_s6, %s1532_s26 }
 0x640   : > { %v878_v34 = vpop.f32.mrf.mxu1  ;;  %p1541_p1 = por %p1540_p0, %p1539_p11 }
 0x641   : > { %1062 = vrot.lane.b32.xlu1 %v878_v34, %s1621_s7 }
 0x642   : > { %v1362_v35 = vpop.f32.mrf.mxu1  ;;  %p1542_p3 = pnand %p1541_p1, %p1535_p8 }
 0x644   : > { %v1053_v36 = vpop.f32.mrf.mxu1 }
 0x645   : > { %1066 = vrot.lane.b32.xlu0 %v1053_v36, %s1622_s8 }
 0x646   : > { %v1372_v37 = vpop.f32.mrf.mxu1 }
 0x6af   : > { %v1059_v38 = vpop.permute.xlu0 %1058 }
 0x6b0   : > { %v1069_v0 = vsel %vm355_vm2, %v1832_v53, %v1059_v38 }
 0x6b3   : > { %v1063_v39 = vpop.permute.xlu1 %1062 }
 0x6b4   : > { %v1071_v40 = vsel %vm1070_vm0, %v1069_v0, %v1063_v39 }
 0x6b7   : > { %v1067_v41 = vpop.permute.xlu0 %1066 }
 0x6b8   : > { %v1073_v42 = vsel %vm1072_vm3, %v1071_v40, %v1067_v41 }
 0x6b9   : > { %1382 = vmatmul.mubr.msk.f32.vlgmr.msra.gmra.mxu0 %vm272_vm1, %v1073_v42 }
 0x779   : > { %v1154_v44 = vpop.f32.mrf.mxu0 }
 0x77a   : > { %v1155_v45 = vadd.f32 %v1290_v43, %v1154_v44 }
 0x77b   : > { %v1383_v46 = vpop.f32.mrf.mxu0 }
 0x77c   : > { %1158 = vst.msk [vmem:[%s258_s14] sm:$0xff] %vm272_vm1, %v1155_v45 }
 0x77d   : > { %1545 = shalt.err (!%p1542_p3)
}
 0x77e   : > { %s1546_s7 = scalar_lea.hbm %s1878_s23, 128  ;;  %s1550_s10 = scalar_lea.hbm %s1919_s5, 256 }
 0x77f   : > { %p1547_p2 = scmp.ne.s32.totalorder %s1878_s23, %s1546_s7  ;;  %p1551_p7 = scmp.lt.s32.totalorder %s1878_s23, %s1919_s5 }
 0x780   : > { %p1552_p6 = scmp.lt.s32.totalorder %s1550_s10, %s1546_s7 }
 0x781   : > { %p1548_p4 = pnand %p1547_p2, %p1692_p5 }
 0x782   : > { %p1553_p9 = por %p1552_p6, %p1551_p7 }
 0x783   : > { %p1549_p13 = pneg %p1548_p4 }
 0x785   : > { %p1554_p10 = pnand %p1553_p9, %p1549_p13 }
 0x787   : > { %1557 = shalt.err (!%p1554_p10)
}
 0x788   : > { %1392 = dma.vmem_to_hbm [thread:$0]  (%p1692_p5), %s1174_s15, 128, %s1878_s23, %s1160_s25  }
 0x789 PF: > { %p1409_p12 = scmp.ge.s32.totalorder %s1600_s21, 2  ;;  %s1185_s13 = sand.u32 1, %s1588_s18  }
 0x78a   : > { %p1929_p8 = scmp.ne.s32.totalorder %s1922_s29, 0  ;;  %s1186_s14 = scalar_lea.sflag [#allocation4], %s1185_s13 }
 0x78c   : > { %p1402_p11 = pnand %p1409_p12, %p1929_p8 }
 0x78e   : > { %p1403_p0 = pneg %p1402_p11 }
 0x790   : > { %1583 = dma.done.wait (%p1403_p0), %s1186_s14, 128  }
 0x791   : > { %1585 = vsyncadd (%p1403_p0), %s1186_s14, 4294967168  ;;  %p17_p1 = scmp.ge.s32.totalorder %s1679_s24, 4   ;;  %s1930_s18 = smov %s1592_s19 }
 0x792   : > { %s1931_s19 = smov %s1596_s20  ;;  %s1932_s20 = smov %s1690_s27 }
 0x793   : > { %s1933_s21 = smov %s1679_s24  ;;  %19 = sbr.rel (!%p17_p1) target bundleno = 5 (0x5), region = 87 }
 0x798   :  { %1191 = vsyncpa [#allocation3], 1 }
 0x799   :  { %1193 = vsyncpa [#allocation3 + $0x1], 1 }
 0x79a   :  { %1194 = vsyncpa [#allocation6], 1 }
 0x79b   :  { %1195 = vsyncpa [#allocation4], 1 }
 0x79c   :  { %1197 = vsyncpa [#allocation4 + $0x1], 1 }

</bundles_post_ra>
